<compile_context>
chip_gen: v7x
topology: tpu7x:2x2x1
jax: 0.10.0
libtpu: 0.0.40
codegen_flags: <defaults>
</compile_context>

<pallas_src>
import functools

import jax
import jax.numpy as jnp
from jax.experimental import pallas as pl
from jax.experimental.pallas import tpu as pltpu

LOG_SIG_MAX = 2.0
LOG_SIG_MIN = -20.0


def _round_up(x, m):
    return ((x + m - 1) // m) * m


def _cdiv(a, b):
    return -(-a // b)


# --------------------------------------------------------------------------
# Kernel
# --------------------------------------------------------------------------
def gaussian_policy_kernel(num_actions,
                           state_ref, w1_ref, b1_ref, w2_ref, b2_ref,
                           wh_ref, bh_ref, out_ref):
    """One batch tile: two hidden layers + fused (mean | log_std) head."""
    x = state_ref[...]                                     # bf16 tile

    h1 = jnp.dot(x, w1_ref[...], preferred_element_type=jnp.float32) + b1_ref[...]
    h1 = jnp.maximum(h1, 0.0)

    h2 = jnp.dot(h1.astype(jnp.bfloat16), w2_ref[...],
                 preferred_element_type=jnp.float32) + b2_ref[...]
    h2 = jnp.maximum(h2, 0.0)

    # Fused heads: columns [0, A) = mean, [A, 2A) = log_std, rest = zero pad.
    y = jnp.dot(h2.astype(jnp.bfloat16), wh_ref[...],
                preferred_element_type=jnp.float32) + bh_ref[...]

    # Clamp only the log_std lanes (mean lanes pass through unchanged).
    col = jax.lax.broadcasted_iota(jnp.int32, y.shape, 1)
    is_log_std = jnp.logical_and(col >= num_actions, col < 2 * num_actions)
    y = jnp.where(is_log_std, jnp.clip(y, LOG_SIG_MIN, LOG_SIG_MAX), y)

    out_ref[...] = y.astype(out_ref.dtype)


# --------------------------------------------------------------------------
# VMEM budgeting / batch-tile selection
# --------------------------------------------------------------------------
def _vmem_budget_bytes():
    """Generation-aware usable-VMEM budget (leaves headroom for the compiler)."""
    try:
        cap = int(pltpu.get_tpu_info().vmem_capacity_bytes)
    except Exception:
        cap = 64 << 20      # conservative fallback (v7x per-TensorCore VMEM)
    return int(cap * 3 // 4)


def _vmem_footprint_bytes(tb, in_pad, h_pad, head_pad):
    # Resident (single-copy) weights: bf16 matrices + f32 biases.
    weights = (2 * (in_pad * h_pad + h_pad * h_pad + h_pad * head_pad)
               + 4 * (2 * h_pad + head_pad))
    # Double-buffered pipelined tiles: bf16 state in, f32 output out.
    act_io = 2 * tb * in_pad * 2 + 2 * tb * head_pad * 4
    # In-kernel intermediates: h1/h2 in f32 + their bf16 copies, y + mask.
    interm = 2 * tb * h_pad * (4 + 2) + tb * head_pad * (4 + 4)
    return weights + act_io + interm


def _select_tb(batch, block_batch, in_pad, h_pad, head_pad, budget):
    """Batch tile: multiple of 16, >=2 grid steps when possible, VMEM-fitting,
    and sized from cdiv(B, n_tiles) so padding waste stays bounded."""
    block_batch = max(16, block_batch)
    min_tiles = 2 if batch > 16 else 1      # 2+ steps -> both v7x TCs get work
    n = min_tiles
    while True:
        tb = max(16, _round_up(_cdiv(batch, n), 16))
        if tb <= block_batch and _vmem_footprint_bytes(tb, in_pad, h_pad, head_pad) <= budget:
            return tb
        if tb <= 16:
            return 16
        n += 1


# --------------------------------------------------------------------------
# Parameter preparation (run ONCE; the per-call path only touches the state)
# --------------------------------------------------------------------------
def prepare_params(params):
    """Pad to lane-dense shapes, fuse the two heads, cast weights to bf16."""
    num_inputs, hidden = params["w1"].shape
    num_actions = params["wm"].shape[1]

    in_pad = _round_up(num_inputs, 128)
    h_pad = _round_up(hidden, 128)
    head_pad = _round_up(2 * num_actions, 128)

    def pad2(a, rows, cols, dtype):
        a = jnp.asarray(a, dtype)
        return jnp.pad(a, ((0, rows - a.shape[0]), (0, cols - a.shape[1])))

    wh = jnp.concatenate([params["wm"], params["ws"]], axis=1)
    bh = jnp.concatenate([params["bm"], params["bs"]], axis=1)

    prepared = {
        "w1": pad2(params["w1"], in_pad, h_pad, jnp.bfloat16),
        "b1": pad2(params["b1"], 1, h_pad, jnp.float32),
        "w2": pad2(params["w2"], h_pad, h_pad, jnp.bfloat16),
        "b2": pad2(params["b2"], 1, h_pad, jnp.float32),
        "wh": pad2(wh, h_pad, head_pad, jnp.bfloat16),
        "bh": pad2(bh, 1, head_pad, jnp.float32),
        "num_inputs": num_inputs,
        "num_actions": num_actions,
        "in_pad": in_pad,
        "h_pad": h_pad,
        "head_pad": head_pad,
    }
    # Materialize once so per-call dispatch doesn't redo pad/concat/cast.
    prepared = {k: (jax.device_put(v) if isinstance(v, jnp.ndarray) else v)
                for k, v in prepared.items()}
    return prepared


# --------------------------------------------------------------------------
# Forward
# --------------------------------------------------------------------------
def gaussian_policy_forward(state, prepared, *, block_batch=512):
    """state: [B, num_inputs] f32. prepared: output of prepare_params.

    Returns (mean, log_std), each [B, num_actions] f32.
    """
    B, num_inputs = state.shape
    assert num_inputs == prepared["num_inputs"]
    A = prepared["num_actions"]
    IN_PAD, H_PAD, HEAD_PAD = prepared["in_pad"], prepared["h_pad"], prepared["head_pad"]

    budget = _vmem_budget_bytes()
    TB = _select_tb(B, block_batch, IN_PAD, H_PAD, HEAD_PAD, budget)
    n_tiles = _cdiv(B, TB)
    B_PAD = n_tiles * TB

    # State streamed in bf16 (the kernel consumes bf16 anyway) -> half DMA.
    x = jnp.pad(state.astype(jnp.bfloat16),
                ((0, B_PAD - B), (0, IN_PAD - num_inputs)))

    footprint = _vmem_footprint_bytes(TB, IN_PAD, H_PAD, HEAD_PAD)
    vmem_limit = int(min(max(footprint + (8 << 20), 32 << 20), budget))

    flops = 2 * B_PAD * (IN_PAD * H_PAD + H_PAD * H_PAD + H_PAD * HEAD_PAD)
    bytes_accessed = (x.size * 2
                      + (prepared["w1"].size + prepared["w2"].size + prepared["wh"].size) * 2
                      + (prepared["b1"].size + prepared["b2"].size + prepared["bh"].size) * 4
                      + B_PAD * HEAD_PAD * 4)

    # Whole-array VMEM residency for weights/biases (single copy, no per-step
    # DMA, no double-buffering).
    resident = pl.BlockSpec(memory_space=pltpu.MemorySpace.VMEM)

    out = pl.pallas_call(
        functools.partial(gaussian_policy_kernel, A),
        out_shape=jax.ShapeDtypeStruct((B_PAD, HEAD_PAD), jnp.float32),
        grid=(n_tiles,),
        in_specs=[
            pl.BlockSpec((TB, IN_PAD), lambda i: (i, 0)),   # state (tiled, bf16)
            resident,                                        # W1
            resident,                                        # b1
            resident,                                        # W2
            resident,                                        # b2
            resident,                                        # W_heads
            resident,                                        # b_heads
        ],
        out_specs=pl.BlockSpec((TB, HEAD_PAD), lambda i: (i, 0)),
        compiler_params=pltpu.CompilerParams(
            dimension_semantics=("parallel",),
            vmem_limit_bytes=vmem_limit,
        ),
        cost_estimate=pl.CostEstimate(
            flops=int(flops), transcendentals=0,
            bytes_accessed=int(bytes_accessed)),
    )(x, prepared["w1"], prepared["b1"], prepared["w2"], prepared["b2"],
      prepared["wh"], prepared["bh"])

    mean = out[:B, :A]
    log_std = out[:B, A:2 * A]
    return mean, log_std


# --------------------------------------------------------------------------
# Test harness
# --------------------------------------------------------------------------
def init_params(key, num_inputs, num_actions, hidden_dim):
    """Deterministic synthetic init (PyTorch-Linear-like uniform fan-in bound)."""
    ks = jax.random.split(key, 8)

    def lin(kw, kb, fan_in, fan_out):
        bound = 1.0 / jnp.sqrt(fan_in)
        w = jax.random.uniform(kw, (fan_in, fan_out), jnp.float32, -bound, bound)
        b = jax.random.uniform(kb, (1, fan_out), jnp.float32, -bound, bound)
        return w, b

    w1, b1 = lin(ks[0], ks[1], num_inputs, hidden_dim)
    w2, b2 = lin(ks[2], ks[3], hidden_dim, hidden_dim)
    wm, bm = lin(ks[4], ks[5], hidden_dim, num_actions)
    ws, bs = lin(ks[6], ks[7], hidden_dim, num_actions)
    return {"w1": w1, "b1": b1, "w2": w2, "b2": b2,
            "wm": wm, "bm": bm, "ws": ws, "bs": bs}


def reference_forward(state, p):
    x = jnp.maximum(state @ p["w1"] + p["b1"], 0.0)
    x = jnp.maximum(x @ p["w2"] + p["b2"], 0.0)
    mean = x @ p["wm"] + p["bm"]
    log_std = jnp.clip(x @ p["ws"] + p["bs"], LOG_SIG_MIN, LOG_SIG_MAX)
    return mean, log_std


if __name__ == "__main__":
    key = jax.random.PRNGKey(0)
    k_state, k_params = jax.random.split(key)

    # Small shapes consistent with the module: state [B, num_inputs].
    B, num_inputs, num_actions, hidden_dim = 8, 16, 8, 32

    state = jax.random.normal(k_state, (B, num_inputs), dtype=jnp.float32)
    params = init_params(k_params, num_inputs, num_actions, hidden_dim)

    prepared = prepare_params(params)              # one-time pad/fuse/cast
    mean, log_std = gaussian_policy_forward(state, prepared)
    jax.block_until_ready((mean, log_std))

    # Cross-check against a plain-JAX f32 reference of the same math.
    ref_mean, ref_log_std = reference_forward(state, params)
    assert mean.shape == (B, num_actions) and log_std.shape == (B, num_actions)
    # Kernel uses bf16 weights/state with f32 accumulation -> loosened tolerance.
    assert jnp.allclose(mean, ref_mean, atol=3e-2, rtol=3e-2)
    assert jnp.allclose(log_std, ref_log_std, atol=3e-2, rtol=3e-2)

    print("KERNEL_OK")
</pallas_src>

<mosaic_0001>
module attributes {stable_mosaic.version = 11 : i64} {
  func.func @gaussian_policy_kernel(%arg0: i32, %arg1: memref<16x128xbf16, #tpu.memory_space<vmem>>, %arg2: memref<128x128xbf16, #tpu.memory_space<vmem>>, %arg3: memref<1x128xf32, #tpu.memory_space<vmem>>, %arg4: memref<128x128xbf16, #tpu.memory_space<vmem>>, %arg5: memref<1x128xf32, #tpu.memory_space<vmem>>, %arg6: memref<128x128xbf16, #tpu.memory_space<vmem>>, %arg7: memref<1x128xf32, #tpu.memory_space<vmem>>, %arg8: memref<16x128xf32, #tpu.memory_space<vmem>>) attributes {dimension_semantics = [#tpu.dimension_semantics<parallel>], iteration_bounds = array<i64: 1>, scalar_prefetch = 0 : i64, scratch_operands = 0 : i64, tpu.core_type = #tpu.core_type<tc>, window_params = [{transform_indices = @transform_0, window_bounds = array<i64: 16, 128>}, {pipeline_mode = #tpu.pipeline_mode<synchronous>, transform_indices = @transform_1, window_bounds = array<i64: 128, 128>}, {pipeline_mode = #tpu.pipeline_mode<synchronous>, transform_indices = @transform_2, window_bounds = array<i64: 1, 128>}, {pipeline_mode = #tpu.pipeline_mode<synchronous>, transform_indices = @transform_3, window_bounds = array<i64: 128, 128>}, {pipeline_mode = #tpu.pipeline_mode<synchronous>, transform_indices = @transform_4, window_bounds = array<i64: 1, 128>}, {pipeline_mode = #tpu.pipeline_mode<synchronous>, transform_indices = @transform_5, window_bounds = array<i64: 128, 128>}, {pipeline_mode = #tpu.pipeline_mode<synchronous>, transform_indices = @transform_6, window_bounds = array<i64: 1, 128>}, {transform_indices = @transform_7, window_bounds = array<i64: 16, 128>}]} {
    %c0 = arith.constant 0 : index
    %c0_0 = arith.constant 0 : index
    %0 = vector.load %arg1[%c0, %c0_0] : memref<16x128xbf16, #tpu.memory_space<vmem>>, vector<16x128xbf16>
    %c0_1 = arith.constant 0 : index
    %c0_2 = arith.constant 0 : index
    %1 = vector.load %arg2[%c0_1, %c0_2] : memref<128x128xbf16, #tpu.memory_space<vmem>>, vector<128x128xbf16>
    %cst = arith.constant dense<0.000000e+00> : vector<16x128xf32>
    %2 = tpu.matmul %0, %1, %cst {dimension_numbers = #tpu.dot_dimension_numbers<[1], [0], [0], [1], [0, 0, 1, 1], [], []>} : vector<16x128xbf16>, vector<128x128xbf16>, vector<16x128xf32> -> vector<16x128xf32>
    %c0_3 = arith.constant 0 : index
    %c0_4 = arith.constant 0 : index
    %3 = vector.load %arg3[%c0_3, %c0_4] : memref<1x128xf32, #tpu.memory_space<vmem>>, vector<1x128xf32>
    %4 = vector.broadcast %3 : vector<1x128xf32> to vector<16x128xf32>
    %5 = arith.addf %2, %4 : vector<16x128xf32>
    %cst_5 = arith.constant 0.000000e+00 : f32
    %6 = vector.broadcast %cst_5 : f32 to vector<16x128xf32>
    %7 = arith.maximumf %5, %6 : vector<16x128xf32>
    %8 = arith.truncf %7 : vector<16x128xf32> to vector<16x128xbf16>
    %c0_6 = arith.constant 0 : index
    %c0_7 = arith.constant 0 : index
    %9 = vector.load %arg4[%c0_6, %c0_7] : memref<128x128xbf16, #tpu.memory_space<vmem>>, vector<128x128xbf16>
    %cst_8 = arith.constant dense<0.000000e+00> : vector<16x128xf32>
    %10 = tpu.matmul %8, %9, %cst_8 {dimension_numbers = #tpu.dot_dimension_numbers<[1], [0], [0], [1], [0, 0, 1, 1], [], []>} : vector<16x128xbf16>, vector<128x128xbf16>, vector<16x128xf32> -> vector<16x128xf32>
    %c0_9 = arith.constant 0 : index
    %c0_10 = arith.constant 0 : index
    %11 = vector.load %arg5[%c0_9, %c0_10] : memref<1x128xf32, #tpu.memory_space<vmem>>, vector<1x128xf32>
    %12 = vector.broadcast %11 : vector<1x128xf32> to vector<16x128xf32>
    %13 = arith.addf %10, %12 : vector<16x128xf32>
    %cst_11 = arith.constant 0.000000e+00 : f32
    %14 = vector.broadcast %cst_11 : f32 to vector<16x128xf32>
    %15 = arith.maximumf %13, %14 : vector<16x128xf32>
    %16 = arith.truncf %15 : vector<16x128xf32> to vector<16x128xbf16>
    %c0_12 = arith.constant 0 : index
    %c0_13 = arith.constant 0 : index
    %17 = vector.load %arg6[%c0_12, %c0_13] : memref<128x128xbf16, #tpu.memory_space<vmem>>, vector<128x128xbf16>
    %cst_14 = arith.constant dense<0.000000e+00> : vector<16x128xf32>
    %18 = tpu.matmul %16, %17, %cst_14 {dimension_numbers = #tpu.dot_dimension_numbers<[1], [0], [0], [1], [0, 0, 1, 1], [], []>} : vector<16x128xbf16>, vector<128x128xbf16>, vector<16x128xf32> -> vector<16x128xf32>
    %c0_15 = arith.constant 0 : index
    %c0_16 = arith.constant 0 : index
    %19 = vector.load %arg7[%c0_15, %c0_16] : memref<1x128xf32, #tpu.memory_space<vmem>>, vector<1x128xf32>
    %20 = vector.broadcast %19 : vector<1x128xf32> to vector<16x128xf32>
    %21 = arith.addf %18, %20 : vector<16x128xf32>
    %22 = tpu.iota {dimensions = array<i32: 1>} : vector<16x128xi32>
    %c8_i32 = arith.constant 8 : i32
    %23 = vector.broadcast %c8_i32 : i32 to vector<16x128xi32>
    %24 = arith.cmpi sge, %22, %23 : vector<16x128xi32>
    %c16_i32 = arith.constant 16 : i32
    %25 = vector.broadcast %c16_i32 : i32 to vector<16x128xi32>
    %26 = arith.cmpi slt, %22, %25 : vector<16x128xi32>
    %27 = arith.andi %24, %26 : vector<16x128xi1>
    %cst_17 = arith.constant -2.000000e+01 : f32
    %cst_18 = arith.constant 2.000000e+00 : f32
    %28 = vector.broadcast %cst_17 : f32 to vector<16x128xf32>
    %29 = arith.maximumf %28, %21 : vector<16x128xf32>
    %30 = vector.broadcast %cst_18 : f32 to vector<16x128xf32>
    %31 = arith.minimumf %30, %29 : vector<16x128xf32>
    %32 = arith.select %27, %31, %21 : vector<16x128xi1>, vector<16x128xf32>
    %c0_19 = arith.constant 0 : index
    %c0_20 = arith.constant 0 : index
    %33 = vector.load %arg8[%c0_19, %c0_20] : memref<16x128xf32, #tpu.memory_space<vmem>>, vector<16x128xf32>
    tpu.vector_store %arg8[%c0_19, %c0_20], %32 {strides = array<i32>} : memref<16x128xf32, #tpu.memory_space<vmem>>, vector<16x128xf32>,
    return
  }
  func.func @transform_0(%arg0: i32) -> (i32, i32) {
    %c0_i32 = arith.constant 0 : i32
    %c0_i32_0 = arith.constant 0 : i32
    return %arg0, %c0_i32 : i32, i32
  }
  func.func @transform_1(%arg0: i32) -> (i32, i32) {
    %c0_i32 = arith.constant 0 : i32
    %c0_i32_0 = arith.constant 0 : i32
    %c0_i32_1 = arith.constant 0 : i32
    return %c0_i32, %c0_i32_0 : i32, i32
  }
  func.func @transform_2(%arg0: i32) -> (i32, i32) {
    %c0_i32 = arith.constant 0 : i32
    %c0_i32_0 = arith.constant 0 : i32
    %c0_i32_1 = arith.constant 0 : i32
    return %c0_i32, %c0_i32_0 : i32, i32
  }
  func.func @transform_3(%arg0: i32) -> (i32, i32) {
    %c0_i32 = arith.constant 0 : i32
    %c0_i32_0 = arith.constant 0 : i32
    %c0_i32_1 = arith.constant 0 : i32
    return %c0_i32, %c0_i32_0 : i32, i32
  }
  func.func @transform_4(%arg0: i32) -> (i32, i32) {
    %c0_i32 = arith.constant 0 : i32
    %c0_i32_0 = arith.constant 0 : i32
    %c0_i32_1 = arith.constant 0 : i32
    return %c0_i32, %c0_i32_0 : i32, i32
  }
  func.func @transform_5(%arg0: i32) -> (i32, i32) {
    %c0_i32 = arith.constant 0 : i32
    %c0_i32_0 = arith.constant 0 : i32
    %c0_i32_1 = arith.constant 0 : i32
    return %c0_i32, %c0_i32_0 : i32, i32
  }
  func.func @transform_6(%arg0: i32) -> (i32, i32) {
    %c0_i32 = arith.constant 0 : i32
    %c0_i32_0 = arith.constant 0 : i32
    %c0_i32_1 = arith.constant 0 : i32
    return %c0_i32, %c0_i32_0 : i32, i32
  }
  func.func @transform_7(%arg0: i32) -> (i32, i32) {
    %c0_i32 = arith.constant 0 : i32
    %c0_i32_0 = arith.constant 0 : i32
    return %arg0, %c0_i32 : i32, i32
  }
}

</mosaic_0001>

<bundles_post_ra>
// kernel: tpu_custom_call.1
= control target key start
LH: loop header
LB: loop body
LE: loop exit
PB: predicated region body
PF: predicated region fallthrough
CT: control target
= control target key end

     0   :  { %12 = vsyncpa [#allocation3], 0  ;;  %s910_s0 = inlined_call_operand.hbm [shape: bf16[16,128], index: 0, kind: input, shape index: {}]   ;;  %s911_s1 = inlined_call_operand.hbm [shape: bf16[128,128], index: 1, kind: input, shape index: {}]   ;;  %s912_s2 = inlined_call_operand.vmem [shape: f32[1,128], index: 2, kind: input, shape index: {}]   ;;  %s913_s3 = inlined_call_operand.hbm [shape: bf16[128,128], index: 3, kind: input, shape index: {}]   ;;  %s914_s4 = inlined_call_operand.vmem [shape: f32[1,128], index: 4, kind: input, shape index: {}]   ;;  %s915_s5 = inlined_call_operand.hbm [shape: bf16[128,128], index: 5, kind: input, shape index: {}]   ;;  %s916_s6 = inlined_call_operand.vmem [shape: f32[1,128], index: 6, kind: input, shape index: {}]   ;;  %s917_s7 = inlined_call_operand.hbm [shape: f32[16,128], index: 7, kind: output, shape index: {}]  }
   0x1   :  { %13 = vsyncpa [#allocation6], 0 }
   0x2   :  { %14 = vsyncpa [#allocation9], 0 }
   0x3   :  { %15 = vsyncpa [#allocation4], 0  ;;  %s734_s24 = smov [#allocation5]   ;;  %s735_s26 = smov [#allocation2]  }
   0x4   :  { %s33_s25 = sshll.u32 %s734_s24, 4  ;;  %s21_s27 = sshll.u32 %s735_s26, 4  ;;  %s34_s25 = int_to_ptr.vmem [resolvable:$true] %s33_s25  ;;  %s785_s27 = int_to_ptr.vmem [resolvable:$true] %s21_s27 }
   0x5   :  { %s616_s30 = scalar_lea.hbm %s911_s1, 1024 }
   0x6   :  { %p617_p0 = scmp.ne.s32.totalorder %s911_s1, %s616_s30  ;;  %p620_p1 = scmp.lt.u32.totalorder %s616_s30, %s911_s1 }
   0x8   :  { %p622_p2 = pnand %p620_p1, %p617_p0 }
   0xa   :  { %625 = shalt.err (!%p622_p2)
}
   0xb   :  { %s626_s12 = scalar_lea.vmem %s34_s25, 1024  ;;  %p631_p4 = scmp.lt.s32.totalorder %s34_s25, %s34_s25 }
   0xc   :  { %p627_p3 = scmp.ne.s32.totalorder %s34_s25, %s626_s12  ;;  %p632_p5 = scmp.lt.s32.totalorder %s626_s12, %s626_s12 }
   0xe   :  { %p633_p6 = por %p632_p5, %p631_p4 }
  0x10   :  { %p634_p7 = pnand %p633_p6, %p627_p3 }
  0x12   :  { %637 = shalt.err (!%p634_p7)
}
  0x13   :  { %s736_s13 = smov 64   ;;  %s737_s14 = smov 4  }
  0x14   :  { %39 = dma.hbm_to_vmem [thread:$0]  %s911_s1, 1024, %s34_s25, [#allocation6], %s736_s13, %s736_s13, %s737_s14  }
  0x15   :  { %s638_s19 = scalar_lea.hbm %s910_s0, 128 }
  0x16   :  { %p639_p8 = scmp.ne.s32.totalorder %s910_s0, %s638_s19  ;;  %p642_p9 = scmp.lt.u32.totalorder %s638_s19, %s910_s0 }
  0x18   :  { %p644_p10 = pnand %p642_p9, %p639_p8 }
  0x1a   :  { %647 = shalt.err (!%p644_p10)
}
  0x1b   :  { %s648_s24 = scalar_lea.vmem %s785_s27, 128  ;;  %p653_p12 = scmp.lt.s32.totalorder %s785_s27, %s785_s27 }
  0x1c   :  { %p649_p11 = scmp.ne.s32.totalorder %s785_s27, %s648_s24  ;;  %p654_p13 = scmp.lt.s32.totalorder %s648_s24, %s648_s24 }
  0x1e   :  { %p655_p0 = por %p654_p13, %p653_p12 }
  0x20   :  { %p656_p1 = pnand %p655_p0, %p649_p11 }
  0x22   :  { %659 = shalt.err (!%p656_p1)
}
  0x23   :  { %27 = dma.hbm_to_vmem [thread:$0]  %s910_s0, 128, %s785_s27, [#allocation3], %s736_s13, %s736_s13, %s737_s14  }
  0x24   :  { %s738_s26 = smov [#allocation7]   ;;  %s739_s29 = smov [#allocation8]  }
  0x25   :  { %s47_s28 = sshll.u32 %s738_s26, 4  ;;  %s61_s30 = sshll.u32 %s739_s29, 4  ;;  %s48_s28 = int_to_ptr.vmem [resolvable:$true] %s47_s28  ;;  %s822_s30 = int_to_ptr.vmem [resolvable:$true] %s61_s30 }
  0x26   :  { %s660_s10 = scalar_lea.hbm %s913_s3, 1024 }
  0x27   :  { %p661_p2 = scmp.ne.s32.totalorder %s913_s3, %s660_s10  ;;  %p664_p3 = scmp.lt.u32.totalorder %s660_s10, %s913_s3 }
  0x29   :  { %p666_p4 = pnand %p664_p3, %p661_p2 }
  0x2b   :  { %669 = shalt.err (!%p666_p4)
}
  0x2c   :  { %s670_s0 = scalar_lea.vmem %s48_s28, 1024  ;;  %p675_p6 = scmp.lt.s32.totalorder %s48_s28, %s48_s28 }
  0x2d   :  { %p671_p5 = scmp.ne.s32.totalorder %s48_s28, %s670_s0  ;;  %p676_p7 = scmp.lt.s32.totalorder %s670_s0, %s670_s0 }
  0x2f   :  { %p677_p8 = por %p676_p7, %p675_p6 }
  0x31   :  { %p678_p9 = pnand %p677_p8, %p671_p5 }
  0x33   :  { %681 = shalt.err (!%p678_p9)
}
  0x34   :  { %53 = dma.hbm_to_vmem [thread:$0]  %s913_s3, 1024, %s48_s28, [#allocation6], %s736_s13, %s736_s13, %s737_s14  }
  0x35   :  { %s682_s20 = scalar_lea.hbm %s915_s5, 1024 }
  0x36   :  { %p683_p10 = scmp.ne.s32.totalorder %s915_s5, %s682_s20  ;;  %p686_p11 = scmp.lt.u32.totalorder %s682_s20, %s915_s5 }
  0x38   :  { %p688_p12 = pnand %p686_p11, %p683_p10 }
  0x3a   :  { %691 = shalt.err (!%p688_p12)
}
  0x3b   :  { %s692_s1 = scalar_lea.vmem %s822_s30, 1024  ;;  %p697_p0 = scmp.lt.s32.totalorder %s822_s30, %s822_s30 }
  0x3c   :  { %p693_p13 = scmp.ne.s32.totalorder %s822_s30, %s692_s1  ;;  %p698_p1 = scmp.lt.s32.totalorder %s692_s1, %s692_s1 }
  0x3e   :  { %p699_p2 = por %p698_p1, %p697_p0 }
  0x40   :  { %p700_p3 = pnand %p699_p2, %p693_p13 }
  0x42   :  { %703 = shalt.err (!%p700_p3)
}
  0x43   :  { %67 = dma.hbm_to_vmem [thread:$0]  %s915_s5, 1024, %s822_s30, [#allocation9], %s736_s13, %s736_s13, %s737_s14  }
  0x44   :  { %726 = dma.done.wait [#allocation3], 128  }
  0x45   :  { %727 = vsyncadd [#allocation3], 4294967168 }
  0x46   :  { %728 = dma.done.wait [#allocation6], 2048  }
  0x47   :  { %729 = vsyncadd [#allocation6], 4294965248 }
  0x48   :  { %730 = dma.done.wait [#allocation9], 1024  }
  0x49   :  { %731 = vsyncadd [#allocation9], 4294966272  ;;  %v740_v0 = vmov 0.0   ;;  %vm741_vm0 = vmmov 0   ;;  %v591_v1 = vld [vmem:[#allocation5] sm:$0xff]   ;;  %v592_v2 = vld [vmem:[#allocation5 + $0x8] sm:$0xff]   ;;  %v433_v46 = vlaneseq }
  0x4a   :  { %520 = vmatprep.subr.bf16.mxu0 %v740_v0  ;;  %536 = vmatprep.mubr.msk.bf16.mxu0 %vm741_vm0, %v740_v0  ;;  %v593_v3 = vld [vmem:[#allocation5 + $0x10] sm:$0xff]   ;;  %v600_v4 = vld [vmem:[#allocation7] sm:$0xff]   ;;  %v594_v5 = vld [vmem:[#allocation5 + $0x18] sm:$0xff]  }
  0x4b   :  { %540 = vmatprep.subr.bf16.mxu1 %v740_v0  ;;  %556 = vmatprep.mubr.msk.bf16.mxu1 %vm741_vm0, %v740_v0  ;;  %v601_v6 = vld [vmem:[#allocation7 + $0x8] sm:$0xff]   ;;  %v595_v7 = vld [vmem:[#allocation5 + $0x20] sm:$0xff]   ;;  %v602_v8 = vld [vmem:[#allocation7 + $0x10] sm:$0xff]   ;;  %v434_v47 = vand.u32 127, %v433_v46 }
  0x4c   :  { %521 = vmatpush3.bf16.msra.mxu0 %v591_v1  ;;  %541 = vmatpush3.bf16.msra.mxu1 %v600_v4  ;;  %v596_v9 = vld [vmem:[#allocation5 + $0x28] sm:$0xff]   ;;  %v603_v10 = vld [vmem:[#allocation7 + $0x18] sm:$0xff]   ;;  %v597_v11 = vld [vmem:[#allocation5 + $0x30] sm:$0xff]  }
  0x4d   :  { %522 = vmatprep.subr.bf16.mxu0 %v740_v0  ;;  %542 = vmatprep.subr.bf16.mxu1 %v740_v0  ;;  %v604_v12 = vld [vmem:[#allocation7 + $0x20] sm:$0xff]   ;;  %v598_v13 = vld [vmem:[#allocation5 + $0x38] sm:$0xff]   ;;  %v605_v14 = vld [vmem:[#allocation7 + $0x28] sm:$0xff]   ;;  %vm435_vm1 = vcmp.ge.s32.totalorder %v434_v47, 8  ;;  %vm436_vm2 = vcmp.lt.s32.totalorder %v434_v47, 16 }
  0x4e   :  { %v599_v15 = vld [vmem:[#allocation2] sm:$0xff]   ;;  %v606_v16 = vld [vmem:[#allocation7 + $0x30] sm:$0xff]   ;;  %v608_v18 = vld [vmem:[#allocation8] sm:$0xff]  }
  0x4f   :  { %v607_v17 = vld [vmem:[#allocation7 + $0x38] sm:$0xff]   ;;  %v609_v19 = vld [vmem:[#allocation8 + $0x8] sm:$0xff]   ;;  %v610_v20 = vld [vmem:[#allocation8 + $0x10] sm:$0xff]  }
  0x50   :  { %523 = vmatpush3.bf16.msra.mxu0 %v592_v2  ;;  %543 = vmatpush3.bf16.msra.mxu1 %v601_v6  ;;  %v611_v21 = vld [vmem:[#allocation8 + $0x18] sm:$0xff]   ;;  %v612_v22 = vld [vmem:[#allocation8 + $0x20] sm:$0xff]   ;;  %v613_v23 = vld [vmem:[#allocation8 + $0x28] sm:$0xff]  }
  0x51   :  { %524 = vmatprep.subr.bf16.mxu0 %v740_v0  ;;  %544 = vmatprep.subr.bf16.mxu1 %v740_v0  ;;  %v465_v24 = vld [vmem:[%s912_s2] ss:$0 sm:$0xff]  ;;  %v614_v34 = vld [vmem:[#allocation8 + $0x30] sm:$0xff]   ;;  %vm437_vm3 = vmand %vm435_vm1, %vm436_vm2 }
  0x52   :  { %v615_v35 = vld [vmem:[#allocation8 + $0x38] sm:$0xff]  }
  0x53   :  { %v475_v36 = vld [vmem:[%s914_s4] ss:$0 sm:$0xff]  ;;  %s742_s4 = smov [#allocation10]  }
  0x54   :  { %525 = vmatpush3.bf16.msra.mxu0 %v593_v3  ;;  %545 = vmatpush3.bf16.msra.mxu1 %v602_v8  ;;  %v484_v48 = vld [vmem:[%s916_s6] ss:$0 sm:$0xff]  ;;  %s451_s29 = sshll.u32 %s742_s4, 4  ;;  %s452_s29 = int_to_ptr.vmem [resolvable:$true] %s451_s29 }
  0x55   :  { %526 = vmatprep.subr.bf16.mxu0 %v740_v0  ;;  %546 = vmatprep.subr.bf16.mxu1 %v740_v0  ;;  %s704_s6 = scalar_lea.vmem %s452_s29, 256  ;;  %p709_p5 = scmp.lt.s32.totalorder %s452_s29, %s452_s29 }
  0x56   :  { %p705_p4 = scmp.ne.s32.totalorder %s452_s29, %s704_s6  ;;  %p710_p6 = scmp.lt.s32.totalorder %s704_s6, %s704_s6 }
  0x58   :  { %527 = vmatpush3.bf16.msra.mxu0 %v594_v5  ;;  %547 = vmatpush3.bf16.msra.mxu1 %v603_v10  ;;  %p711_p7 = por %p710_p6, %p709_p5 }
  0x59   :  { %528 = vmatprep.subr.bf16.mxu0 %v740_v0  ;;  %548 = vmatprep.subr.bf16.mxu1 %v740_v0 }
  0x5a   :  { %p712_p8 = pnand %p711_p7, %p705_p4 }
  0x5c   :  { %529 = vmatpush3.bf16.msra.mxu0 %v595_v7  ;;  %549 = vmatpush3.bf16.msra.mxu1 %v604_v12 }
  0x5d   :  { %530 = vmatprep.subr.bf16.mxu0 %v740_v0  ;;  %550 = vmatprep.subr.bf16.mxu1 %v740_v0 }
  0x60   :  { %531 = vmatpush3.bf16.msra.mxu0 %v596_v9  ;;  %551 = vmatpush3.bf16.msra.mxu1 %v605_v14 }
  0x61   :  { %532 = vmatprep.subr.bf16.mxu0 %v740_v0  ;;  %552 = vmatprep.subr.bf16.mxu1 %v740_v0 }
  0x64   :  { %533 = vmatpush3.bf16.msra.mxu0 %v597_v11  ;;  %553 = vmatpush3.bf16.msra.mxu1 %v606_v16 }
  0x65   :  { %534 = vmatprep.subr.bf16.mxu0 %v740_v0  ;;  %554 = vmatprep.subr.bf16.mxu1 %v740_v0 }
  0x68   :  { %535 = vmatpush3.bf16.msra.mxu0 %v598_v13  ;;  %555 = vmatpush3.bf16.msra.mxu1 %v607_v17 }
  0x69   :  { %560 = vmatprep.subr.bf16.mxu0 %v740_v0 }
  0x6b   :  { %537 = vmatmul.mubr.bf16.vlgmr.msra.gmra.mrb[0].mxu0 %v599_v15 }
  0x6c   :  { %576 = vmatprep.mubr.msk.bf16.mxu0 %vm741_vm0, %v740_v0  ;;  %561 = vmatpush3.bf16.msra.mxu0 %v608_v18 }
  0x6d   :  { %562 = vmatprep.subr.bf16.mxu0 %v740_v0 }
  0x70   :  { %563 = vmatpush3.bf16.msra.mxu0 %v609_v19 }
  0x71   :  { %564 = vmatprep.subr.bf16.mxu0 %v740_v0 }
  0x74   :  { %565 = vmatpush3.bf16.msra.mxu0 %v610_v20 }
  0x75   :  { %566 = vmatprep.subr.bf16.mxu0 %v740_v0 }
  0x78   :  { %567 = vmatpush3.bf16.msra.mxu0 %v611_v21 }
  0x79   :  { %568 = vmatprep.subr.bf16.mxu0 %v740_v0 }
  0x7c   :  { %569 = vmatpush3.bf16.msra.mxu0 %v612_v22 }
  0x7d   :  { %570 = vmatprep.subr.bf16.mxu0 %v740_v0 }
  0x80   :  { %571 = vmatpush3.bf16.msra.mxu0 %v613_v23 }
  0x81   :  { %572 = vmatprep.subr.bf16.mxu0 %v740_v0 }
  0x84   :  { %573 = vmatpush3.bf16.msra.mxu0 %v614_v34 }
  0x85   :  { %574 = vmatprep.subr.bf16.mxu0 %v740_v0 }
  0x88   :  { %575 = vmatpush3.bf16.msra.mxu0 %v615_v35 }
 0x13e   :  { %v196_v25 = vpop.f32.mrb[0].mxu0 }
 0x13f   :  { %v197_v26 = vadd.f32 %v465_v24, %v196_v25  ;;  %v538_v27 = vpop.f32.mrb[1].mxu0 }
 0x140   :  { %v199_v28 = vpop.f32.mrb[2].mxu0 }
 0x141   :  { %v200_v29 = vadd.f32 %v465_v24, %v199_v28  ;;  %v539_v30 = vpop.f32.mrb[3].mxu0  ;;  %v203_v31 = vmax.f32 %v197_v26, 0.0 }
 0x143   :  { %v204_v32 = vmax.f32 %v200_v29, 0.0 }
 0x145   :  { %v205_v33 = vpack.c.bf16 %v204_v32, %v203_v31 }
 0x147   :  { %557 = vmatmul.mubr.bf16.vlgmr.msra.gmra.mrb[0].mxu1 %v205_v33 }
 0x21a   :  { %v311_v37 = vpop.f32.mrb[0].mxu1 }
 0x21b   :  { %v312_v38 = vadd.f32 %v475_v36, %v311_v37  ;;  %v558_v39 = vpop.f32.mrb[1].mxu1 }
 0x21c   :  { %v314_v40 = vpop.f32.mrb[2].mxu1 }
 0x21d   :  { %v315_v41 = vadd.f32 %v475_v36, %v314_v40  ;;  %v559_v42 = vpop.f32.mrb[3].mxu1  ;;  %v318_v43 = vmax.f32 %v312_v38, 0.0 }
 0x21f   :  { %v319_v44 = vmax.f32 %v315_v41, 0.0 }
 0x221   :  { %v320_v45 = vpack.c.bf16 %v319_v44, %v318_v43 }
 0x223   :  { %577 = vmatmul.mubr.bf16.vlgmr.msra.gmra.mrb[4].mxu0 %v320_v45 }
 0x2f6   :  { %v426_v49 = vpop.f32.mrb[4].mxu0 }
 0x2f7   :  { %v427_v50 = vadd.f32 %v484_v48, %v426_v49  ;;  %v578_v51 = vpop.f32.mrb[5].mxu0 }
 0x2f8   :  { %v429_v52 = vpop.f32.mrb[6].mxu0 }
 0x2f9   :  { %v438_v53 = vmax.f32 %v427_v50, -20.0  ;;  %v430_v54 = vadd.f32 %v484_v48, %v429_v52  ;;  %v579_v55 = vpop.f32.mrb[7].mxu0 }
 0x2fb   :  { %v440_v56 = vmin.f32 %v438_v53, 2.0  ;;  %v439_v57 = vmax.f32 %v430_v54, -20.0 }
 0x2fd   :  { %v442_v58 = vsel %vm437_vm3, %v440_v56, %v427_v50  ;;  %v441_v59 = vmin.f32 %v439_v57, 2.0 }
 0x2fe   :  { %444 = vst [vmem:[#allocation10] sm:$0xff] %v442_v58 }
 0x2ff   :  { %v443_v60 = vsel %vm437_vm3, %v441_v59, %v430_v54 }
 0x300   :  { %445 = vst [vmem:[#allocation10 + $0x8] sm:$0xff] %v443_v60 }
 0x301   :  { %715 = shalt.err (!%p712_p8)
}
 0x302   :  { %s716_s9 = scalar_lea.hbm %s917_s7, 256 }
 0x303   :  { %p717_p9 = scmp.ne.s32.totalorder %s917_s7, %s716_s9  ;;  %p720_p10 = scmp.lt.u32.totalorder %s716_s9, %s917_s7 }
 0x305   :  { %p722_p11 = pnand %p720_p10, %p717_p9 }
 0x307   :  { %725 = shalt.err (!%p722_p11)
}
 0x308   :  { %s743_s16 = smov 128   ;;  %s744_s0 = smov 8  }
 0x309   :  { %457 = dma.vmem_to_hbm [thread:$0]  %s452_s29, 256, %s917_s7, [#allocation4], %s743_s16, %s743_s16, %s744_s0  }
 0x30a   :  { %732 = dma.done.wait [#allocation4], 256  }
 0x30b   :  { %733 = vsyncadd [#allocation4], 4294967040 }
 0x30c   :  { %461 = vsyncpa [#allocation3], 1 }
 0x30d   :  { %462 = vsyncpa [#allocation6], 1 }
 0x30e   :  { %463 = vsyncpa [#allocation9], 1 }
 0x30f   :  { %464 = vsyncpa [#allocation4], 1 }

</bundles_post_ra>
